<compile_context>
chip_gen: v5e
topology: v5e:2x2
jax: 0.10.0
libtpu: 0.0.40
codegen_flags: <defaults>
</compile_context>

<pallas_src>
import functools

import jax
import jax.numpy as jnp
from jax import lax
from jax.experimental import pallas as pl
from jax.experimental.pallas import tpu as pltpu

IGNORE_INDEX = 255     # CE ignore label (matches the PyTorch module)
PAD_INDEX = 254        # padded pixels in the uint8 target stream (excluded everywhere)
SMOOTH = 1e-5
LANES = 128
MAX_TQ = 1024          # upper bound on the sublane extent of a pixel tile


def _round_up(x, m):
    return -(-x // m) * m


def _vmem_capacity_bytes():
    """Physical VMEM of the current generation (conservative fallback: v7x 64 MiB)."""
    try:
        info = pltpu.get_tpu_info()
        for name in ("vmem_capacity_bytes", "vmem_bytes", "vmem_size_bytes"):
            v = getattr(info, name, None)
            if isinstance(v, int) and v > 0:
                return v
    except Exception:
        pass
    return 64 * 2**20


def _num_tensorcores():
    """TensorCores per Pallas program; 1 is the safe default (no intra-image split)."""
    for probe in (lambda: pltpu.get_tpu_info(), lambda: jax.devices()[0]):
        try:
            obj = probe()
        except Exception:
            continue
        for name in ("num_cores", "num_tensorcores", "tensorcores_per_chip",
                     "core_count"):
            v = getattr(obj, name, None)
            if isinstance(v, int) and v > 0:
                return v
    return 1


def _bce_dice_kernel(x_ref, t_ref, out_ref, *, n_classes, n_rows):
    """Accumulate per-tile partial sums into a lane-dense (n_rows, 128) f32 slab.

    x_ref : (C, TQ, 128) logits tile (native dtype; upcast on-chip).  The tile may
            overhang the real pixel range; overhang pixels carry t == PAD_INDEX and
            are removed with selects, so garbage / NaN logits never propagate.
    t_ref : (TQ, 128) uint8 targets (PAD_INDEX = padding, IGNORE_INDEX = CE ignore;
            ignore pixels still count in the Dice z-sum, like the torch module).
    out_ref (n_rows, 128) resident across the pixel-tile grid axis:
        rows [0..C)   : per-class intersect partials  sum(p_i * 1{t==i})
        rows [C..2C)  : per-class z partials          sum(p_i^2)   (pad excluded)
        rows [2C..3C) : per-class y partials          sum(1{t==i})
        row  3C       : cross-entropy partial sum     (ignore+pad excluded)
        row  3C+1     : valid (non-ignored) pixel count
    """
    @pl.when(pl.program_id(1) == 0)
    def _init():
        out_ref[...] = jnp.zeros_like(out_ref)

    t = t_ref[...].astype(jnp.int32)                         # (TQ, 128)
    valid_pix_b = t != PAD_INDEX                              # real pixels (incl. ignore)
    valid_pix = valid_pix_b.astype(jnp.float32)
    valid_ce_b = valid_pix_b & (t != IGNORE_INDEX)
    valid_ce = valid_ce_b.astype(jnp.float32)

    def rsum(v):                                              # sublane partial sum
        return jnp.sum(v, axis=0, keepdims=True)              # (1, 128)
    # TODO(synk): on v7x the sublane sums could be offloaded to the idle MXU
    # (ones @ stat) if a bundle dump confirms the VALU slot is binding.

    if n_classes == 2:
        # BCEDiceLoss always runs with C == 2: 2-class (sigmoid-style) fast path.
        x0 = x_ref[0].astype(jnp.float32)                     # (TQ, 128)
        x1 = x_ref[1].astype(jnp.float32)
        d = x0 - x1
        ed = jnp.exp(-jnp.abs(d))                             # in (0, 1]
        # approx EUP reciprocal: ~1e-3-level error traded for a free slot.
        inv = pl.reciprocal(1.0 + ed, approx=True)            # prob of the larger logit
        lse = jnp.maximum(x0, x1) + jnp.log(1.0 + ed)         # logsumexp(x0, x1)
        p0 = jnp.where(valid_pix_b,
                       jnp.where(x0 >= x1, inv, ed * inv), 0.0)
        p1 = valid_pix - p0                                   # 1 - p0 on real pixels, 0 on pad
        is0 = t == 0
        is1 = t == 1
        ce_pix = jnp.where(valid_ce_b, lse - jnp.where(is0, x0, x1), 0.0)
        rows = [
            rsum(jnp.where(is0, p0, 0.0)),                    # intersect_0
            rsum(jnp.where(is1, p1, 0.0)),                    # intersect_1
            rsum(p0 * p0),                                    # z_0 (ignore pixels included)
            rsum(p1 * p1),                                    # z_1
            rsum(is0.astype(jnp.float32)),                    # y_0
            rsum(is1.astype(jnp.float32)),                    # y_1
            rsum(ce_pix),                                     # CE partial
            rsum(valid_ce),                                   # valid-pixel count
        ]
        if n_rows > len(rows):
            rows.append(jnp.zeros((n_rows - len(rows), LANES), jnp.float32))
        slab = jnp.concatenate(rows, axis=0)
    else:
        # Generic C: vectorized 3-D formulation (no per-class python lists).
        x = x_ref[...].astype(jnp.float32)                    # (C, TQ, 128)
        # Zero the ragged overhang up front so garbage/NaN logits never propagate.
        x = jnp.where(valid_pix_b[None], x, 0.0)
        cls = lax.broadcasted_iota(jnp.int32, x.shape, 0)
        onehot = (t[None] == cls).astype(jnp.float32)         # (C, TQ, 128)
        logit_t = jnp.sum(x * onehot, axis=0)                 # (TQ, 128)
        m = jnp.max(x, axis=0)
        e = jnp.exp(x - m[None])                              # x dead after this
        s = jnp.sum(e, axis=0)
        # One EUP reciprocal; pad mask folded in once -> padded probs are exactly 0.
        inv_s = pl.reciprocal(s, approx=True) * valid_pix
        lse = m + jnp.log(s)
        probs = e * inv_s[None]                               # (C, TQ, 128)
        inter = jnp.sum(probs * onehot, axis=1)               # (C, 128)
        zsum = jnp.sum(probs * probs, axis=1)                 # (C, 128)
        ysum = jnp.sum(onehot, axis=1)                        # (C, 128)
        ce_pix = (lse - logit_t) * valid_ce
        parts = [inter, zsum, ysum, rsum(ce_pix), rsum(valid_ce)]
        pad_rows = n_rows - 3 * n_classes - 2
        if pad_rows > 0:
            parts.append(jnp.zeros((pad_rows, LANES), jnp.float32))
        slab = jnp.concatenate(parts, axis=0)

    out_ref[...] += slab


def bce_dice_loss(logits_nchw, target):
    """0.5 * CE(logits, target, ignore_index=255) + DiceLoss(n_classes=C, softmax=True)."""
    N, C, H, W = logits_nchw.shape
    assert C <= 253, "uint8 target packing reserves 254 (pad) and 255 (ignore)"
    if target.ndim == 4:                    # N,1,H,W -> N,H,W (torch.squeeze)
        target = jnp.squeeze(target, axis=1)
    # TODO(synk): the bilinear F.interpolate branch of the reference cross_entropy
    # (taken only when input/target spatial sizes differ) is not implemented.
    assert target.shape == (N, H, W)

    HW = H * W
    q_raw = pl.cdiv(HW, LANES)
    x_bytes = jnp.dtype(logits_nchw.dtype).itemsize

    # ---- tile size derived from C, dtype and the generation's VMEM ---------
    vmem_cap = _vmem_capacity_bytes()
    budget = min(vmem_cap // 3, 20 * 2**20)
    per_row = LANES * (2 * C * x_bytes       # double-buffered logits
                       + 2                    # double-buffered uint8 targets
                       + (2 * C + 10) * 4)    # f32 temporaries (rough)
    tq_cap = min(MAX_TQ, max(32, (budget // per_row) // 32 * 32))
    if q_raw <= tq_cap:
        tq, qb = q_raw, 1                     # whole pixel axis in one tile
    else:
        tq, qb = tq_cap, pl.cdiv(q_raw, tq_cap)

    # ---- 2-way intra-image split only where it buys parallelism ------------
    ncores = _num_tensorcores()
    split = 2 if (ncores >= 2 and N < 2 and qb >= 2 and qb % 2 == 0) else 1
    qb_per = qb // split

    # ---- free reshapes; logits padded only to the next 128-lane boundary ---
    x3 = logits_nchw.reshape(N, C, HW)
    if q_raw * LANES != HW:
        # Only hit when H*W % 128 != 0 (small pad copy, no round-up to tq).
        x3 = jnp.pad(x3, ((0, 0), (0, 0), (0, q_raw * LANES - HW)))
    x4 = x3.reshape(N, C, q_raw, LANES)

    # Targets travel as uint8 (4x less HBM traffic than int32); the tiny target
    # array is the only thing padded to the full tile grid, carrying PAD_INDEX.
    q_pad = qb * tq
    t2 = target.reshape(N, HW).astype(jnp.uint8)
    if q_pad * LANES != HW:
        t2 = jnp.pad(t2, ((0, 0), (0, q_pad * LANES - HW)),
                     constant_values=PAD_INDEX)
    t3 = t2.reshape(N, q_pad, LANES)

    n_rows = _round_up(3 * C + 2, 8)

    def x_map(s, k):
        if split == 1:
            return (s, 0, k, 0)
        return (s // split, 0, (s % split) * qb_per + k, 0)

    def t_map(s, k):
        if split == 1:
            return (s, k, 0)
        return (s // split, (s % split) * qb_per + k, 0)

    est_need = (2 * (C * tq * LANES * x_bytes + tq * LANES)
                + (2 * C + 10) * tq * LANES * 4
                + 2 * n_rows * LANES * 4)
    vmem_limit = int(min(max(2 * est_need, 16 * 2**20), vmem_cap - 8 * 2**20))

    kernel = functools.partial(_bce_dice_kernel, n_classes=C, n_rows=n_rows)

    out = pl.pallas_call(
        kernel,
        out_shape=jax.ShapeDtypeStruct((N * split, n_rows, LANES), jnp.float32),
        grid_spec=pltpu.PrefetchScalarGridSpec(
            num_scalar_prefetch=0,
            grid=(N * split, qb_per),
            in_specs=[
                pl.BlockSpec((None, C, tq, LANES), x_map),
                pl.BlockSpec((None, tq, LANES), t_map),
            ],
            out_specs=pl.BlockSpec((None, n_rows, LANES),
                                   lambda s, k: (s, 0, 0)),
        ),
        compiler_params=pltpu.CompilerParams(
            dimension_semantics=("parallel", "arbitrary"),
            vmem_limit_bytes=vmem_limit),
    )(x4, t3)

    # Tiny scalar epilogue in plain JAX (cross-lane + cross-image sums).
    stats = jnp.sum(out, axis=(0, 2))                 # (n_rows,)
    inter = stats[0:C]
    zsum = stats[C:2 * C]
    ysum = stats[2 * C:3 * C]
    ce_sum = stats[3 * C]
    cnt = stats[3 * C + 1]

    ce_loss = ce_sum / jnp.maximum(cnt, 1.0)          # guard all-ignored case
    dice_per_class = 1.0 - (2.0 * inter + SMOOTH) / (zsum + ysum + SMOOTH)
    dice_loss = jnp.sum(dice_per_class) / C
    return 0.5 * ce_loss + dice_loss


def _reference_loss(logits_nchw, target):
    """Pure-JAX reference mirroring the PyTorch module (for validation)."""
    N, C, H, W = logits_nchw.shape
    x = logits_nchw.astype(jnp.float32)
    t = target.astype(jnp.int32)
    # cross entropy, reduction='mean', ignore_index=255
    lse = jax.nn.logsumexp(x, axis=1)                           # (N, H, W)
    onehot = jax.nn.one_hot(t, C, axis=1, dtype=jnp.float32)    # (N, C, H, W)
    logit_t = jnp.sum(x * onehot, axis=1)                       # (N, H, W)
    valid = (t != IGNORE_INDEX).astype(jnp.float32)
    ce = jnp.sum((lse - logit_t) * valid) / jnp.sum(valid)
    # dice, softmax=True (ignore_index pixels included in sum(p^2), as in torch)
    p = jax.nn.softmax(x, axis=1)
    dice = 0.0
    for i in range(C):
        inter = jnp.sum(p[:, i] * onehot[:, i])
        zsum = jnp.sum(p[:, i] * p[:, i])
        ysum = jnp.sum(onehot[:, i] * onehot[:, i])
        dice = dice + (1.0 - (2.0 * inter + SMOOTH) / (zsum + ysum + SMOOTH))
    dice = dice / C
    return 0.5 * ce + dice


if __name__ == "__main__":
    # BCEDiceLoss fixes DiceLoss(n_classes=2), so logits must have C == 2.
    N, C, H, W = 2, 2, 16, 16
    key = jax.random.PRNGKey(0)
    k_x, k_t, k_m = jax.random.split(key, 3)
    logits = jax.random.normal(k_x, (N, C, H, W), dtype=jnp.float32)
    target = jax.random.randint(k_t, (N, H, W), 0, C, dtype=jnp.int32)
    # include some ignore_index pixels to exercise the CE mask
    ignore = jax.random.uniform(k_m, (N, H, W)) < 0.1
    target = jnp.where(ignore, IGNORE_INDEX, target).astype(jnp.int32)

    loss = jax.block_until_ready(bce_dice_loss(logits, target))
    ref = jax.block_until_ready(_reference_loss(logits, target))
    # approx EUP reciprocal in the softmax trades ~1e-3-level precision for
    # speed; compare at a correspondingly safe tolerance.
    assert jnp.allclose(loss, ref, atol=3e-3, rtol=3e-3), (loss, ref)
    print("KERNEL_OK")
</pallas_src>

<mosaic_0001>
module attributes {stable_mosaic.version = 11 : i64} {
  func.func @_bce_dice_kernel(%arg0: i32, %arg1: i32, %arg2: memref<1x2x2x128xf32, #tpu.memory_space<vmem>>, %arg3: memref<1x2x128xi8, #tpu.memory_space<vmem>>, %arg4: memref<1x8x128xf32, #tpu.memory_space<vmem>>) attributes {dimension_semantics = [#tpu.dimension_semantics<parallel>, #tpu.dimension_semantics<arbitrary>], iteration_bounds = array<i64: 2, 1>, scalar_prefetch = 0 : i64, scratch_operands = 0 : i64, tpu.core_type = #tpu.core_type<tc>, window_params = [{transform_indices = @transform_0, window_bounds = array<i64: 1, 2, 2, 128>}, {transform_indices = @transform_1, window_bounds = array<i64: 1, 2, 128>}, {transform_indices = @transform_2, window_bounds = array<i64: 1, 8, 128>}]} {
    %c0_i32 = arith.constant 0 : i32
    %0 = arith.cmpi eq, %arg1, %c0_i32 : i32
    %1 = arith.extui %0 : i1 to i32
    %c0_i32_0 = arith.constant 0 : i32
    %2 = arith.cmpi ne, %1, %c0_i32_0 : i32
    scf.if %2 {
      %cst_31 = arith.constant 0.000000e+00 : f32
      %79 = vector.broadcast %cst_31 : f32 to vector<8x128xf32>
      %c0_32 = arith.constant 0 : index
      %c0_33 = arith.constant 0 : index
      %c0_34 = arith.constant 0 : index
      %80 = vector.load %arg4[%c0_32, %c0_33, %c0_34] : memref<1x8x128xf32, #tpu.memory_space<vmem>>, vector<1x8x128xf32>
      %81 = vector.shape_cast %80 : vector<1x8x128xf32> to vector<8x128xf32>
      %82 = vector.shape_cast %79 : vector<8x128xf32> to vector<1x8x128xf32>
      tpu.vector_store %arg4[%c0_32, %c0_33, %c0_34], %82 {strides = array<i32>} : memref<1x8x128xf32, #tpu.memory_space<vmem>>, vector<1x8x128xf32>,
    } else {
    }
    %c0 = arith.constant 0 : index
    %c0_1 = arith.constant 0 : index
    %c0_2 = arith.constant 0 : index
    %3 = vector.load %arg3[%c0, %c0_1, %c0_2] : memref<1x2x128xi8, #tpu.memory_space<vmem>>, vector<1x2x128xi8>
    %4 = vector.shape_cast %3 : vector<1x2x128xi8> to vector<2x128xi8>
    %5 = arith.extui %4 : vector<2x128xi8> to vector<2x128xi32>
    %c254_i32 = arith.constant 254 : i32
    %6 = vector.broadcast %c254_i32 : i32 to vector<2x128xi32>
    %7 = arith.cmpi ne, %5, %6 : vector<2x128xi32>
    %8 = arith.extui %7 : vector<2x128xi1> to vector<2x128xi32>
    %9 = arith.sitofp %8 : vector<2x128xi32> to vector<2x128xf32>
    %c255_i32 = arith.constant 255 : i32
    %10 = vector.broadcast %c255_i32 : i32 to vector<2x128xi32>
    %11 = arith.cmpi ne, %5, %10 : vector<2x128xi32>
    %12 = arith.andi %7, %11 : vector<2x128xi1>
    %13 = arith.extui %12 : vector<2x128xi1> to vector<2x128xi32>
    %14 = arith.sitofp %13 : vector<2x128xi32> to vector<2x128xf32>
    %c0_3 = arith.constant 0 : index
    %c0_4 = arith.constant 0 : index
    %c0_5 = arith.constant 0 : index
    %c0_6 = arith.constant 0 : index
    %15 = vector.load %arg2[%c0_3, %c0_4, %c0_5, %c0_6] : memref<1x2x2x128xf32, #tpu.memory_space<vmem>>, vector<1x1x2x128xf32>
    %16 = vector.shape_cast %15 : vector<1x1x2x128xf32> to vector<2x128xf32>
    %c0_7 = arith.constant 0 : index
    %c1 = arith.constant 1 : index
    %c0_8 = arith.constant 0 : index
    %c0_9 = arith.constant 0 : index
    %17 = vector.load %arg2[%c0_7, %c1, %c0_8, %c0_9] : memref<1x2x2x128xf32, #tpu.memory_space<vmem>>, vector<1x1x2x128xf32>
    %18 = vector.shape_cast %17 : vector<1x1x2x128xf32> to vector<2x128xf32>
    %19 = arith.subf %16, %18 : vector<2x128xf32>
    %20 = math.absf %19 : vector<2x128xf32>
    %cst = arith.constant 0.000000e+00 : f32
    %21 = vector.broadcast %cst : f32 to vector<2x128xf32>
    %22 = arith.subf %21, %20 : vector<2x128xf32>
    %23 = math.exp %22 : vector<2x128xf32>
    %cst_10 = arith.constant 1.000000e+00 : f32
    %24 = vector.broadcast %cst_10 : f32 to vector<2x128xf32>
    %25 = arith.addf %24, %23 : vector<2x128xf32>
    %26 = tpu.reciprocal %25 {approx = true} : vector<2x128xf32> -> vector<2x128xf32>
    %27 = arith.maximumf %16, %18 : vector<2x128xf32>
    %cst_11 = arith.constant 1.000000e+00 : f32
    %28 = vector.broadcast %cst_11 : f32 to vector<2x128xf32>
    %29 = arith.addf %28, %23 : vector<2x128xf32>
    %30 = math.log %29 : vector<2x128xf32>
    %31 = arith.addf %27, %30 : vector<2x128xf32>
    %32 = arith.cmpf oge, %16, %18 : vector<2x128xf32>
    %33 = arith.mulf %23, %26 : vector<2x128xf32>
    %34 = arith.select %32, %26, %33 : vector<2x128xi1>, vector<2x128xf32>
    %cst_12 = arith.constant 0.000000e+00 : f32
    %35 = vector.broadcast %cst_12 : f32 to vector<2x128xf32>
    %36 = arith.select %7, %34, %35 : vector<2x128xi1>, vector<2x128xf32>
    %37 = arith.subf %9, %36 : vector<2x128xf32>
    %c0_i32_13 = arith.constant 0 : i32
    %38 = vector.broadcast %c0_i32_13 : i32 to vector<2x128xi32>
    %39 = arith.cmpi eq, %5, %38 : vector<2x128xi32>
    %c1_i32 = arith.constant 1 : i32
    %40 = vector.broadcast %c1_i32 : i32 to vector<2x128xi32>
    %41 = arith.cmpi eq, %5, %40 : vector<2x128xi32>
    %42 = arith.select %39, %16, %18 : vector<2x128xi1>, vector<2x128xf32>
    %43 = arith.subf %31, %42 : vector<2x128xf32>
    %cst_14 = arith.constant 0.000000e+00 : f32
    %44 = vector.broadcast %cst_14 : f32 to vector<2x128xf32>
    %45 = arith.select %12, %43, %44 : vector<2x128xi1>, vector<2x128xf32>
    %cst_15 = arith.constant 0.000000e+00 : f32
    %46 = vector.broadcast %cst_15 : f32 to vector<2x128xf32>
    %47 = arith.select %39, %36, %46 : vector<2x128xi1>, vector<2x128xf32>
    %cst_16 = arith.constant dense<0.000000e+00> : vector<128xf32>
    %48 = vector.multi_reduction <add>, %47, %cst_16 [0] : vector<2x128xf32> to vector<128xf32>
    %49 = vector.shape_cast %48 : vector<128xf32> to vector<1x128xf32>
    %cst_17 = arith.constant 0.000000e+00 : f32
    %50 = vector.broadcast %cst_17 : f32 to vector<2x128xf32>
    %51 = arith.select %41, %37, %50 : vector<2x128xi1>, vector<2x128xf32>
    %cst_18 = arith.constant dense<0.000000e+00> : vector<128xf32>
    %52 = vector.multi_reduction <add>, %51, %cst_18 [0] : vector<2x128xf32> to vector<128xf32>
    %53 = vector.shape_cast %52 : vector<128xf32> to vector<1x128xf32>
    %54 = arith.mulf %36, %36 : vector<2x128xf32>
    %cst_19 = arith.constant dense<0.000000e+00> : vector<128xf32>
    %55 = vector.multi_reduction <add>, %54, %cst_19 [0] : vector<2x128xf32> to vector<128xf32>
    %56 = vector.shape_cast %55 : vector<128xf32> to vector<1x128xf32>
    %57 = arith.mulf %37, %37 : vector<2x128xf32>
    %cst_20 = arith.constant dense<0.000000e+00> : vector<128xf32>
    %58 = vector.multi_reduction <add>, %57, %cst_20 [0] : vector<2x128xf32> to vector<128xf32>
    %59 = vector.shape_cast %58 : vector<128xf32> to vector<1x128xf32>
    %60 = arith.extui %39 : vector<2x128xi1> to vector<2x128xi32>
    %61 = arith.sitofp %60 : vector<2x128xi32> to vector<2x128xf32>
    %cst_21 = arith.constant dense<0.000000e+00> : vector<128xf32>
    %62 = vector.multi_reduction <add>, %61, %cst_21 [0] : vector<2x128xf32> to vector<128xf32>
    %63 = vector.shape_cast %62 : vector<128xf32> to vector<1x128xf32>
    %64 = arith.extui %41 : vector<2x128xi1> to vector<2x128xi32>
    %65 = arith.sitofp %64 : vector<2x128xi32> to vector<2x128xf32>
    %cst_22 = arith.constant dense<0.000000e+00> : vector<128xf32>
    %66 = vector.multi_reduction <add>, %65, %cst_22 [0] : vector<2x128xf32> to vector<128xf32>
    %67 = vector.shape_cast %66 : vector<128xf32> to vector<1x128xf32>
    %cst_23 = arith.constant dense<0.000000e+00> : vector<128xf32>
    %68 = vector.multi_reduction <add>, %45, %cst_23 [0] : vector<2x128xf32> to vector<128xf32>
    %69 = vector.shape_cast %68 : vector<128xf32> to vector<1x128xf32>
    %cst_24 = arith.constant dense<0.000000e+00> : vector<128xf32>
    %70 = vector.multi_reduction <add>, %14, %cst_24 [0] : vector<2x128xf32> to vector<128xf32>
    %71 = vector.shape_cast %70 : vector<128xf32> to vector<1x128xf32>
    %72 = tpu.concatenate %49, %53, %56, %59, %63, %67, %69, %71 in 0 : vector<1x128xf32>, vector<1x128xf32>, vector<1x128xf32>, vector<1x128xf32>, vector<1x128xf32>, vector<1x128xf32>, vector<1x128xf32>, vector<1x128xf32> -> vector<8x128xf32>
    %c0_25 = arith.constant 0 : index
    %c0_26 = arith.constant 0 : index
    %c0_27 = arith.constant 0 : index
    %73 = vector.load %arg4[%c0_25, %c0_26, %c0_27] : memref<1x8x128xf32, #tpu.memory_space<vmem>>, vector<1x8x128xf32>
    %74 = vector.shape_cast %73 : vector<1x8x128xf32> to vector<8x128xf32>
    %75 = arith.addf %74, %72 : vector<8x128xf32>
    %c0_28 = arith.constant 0 : index
    %c0_29 = arith.constant 0 : index
    %c0_30 = arith.constant 0 : index
    %76 = vector.load %arg4[%c0_28, %c0_29, %c0_30] : memref<1x8x128xf32, #tpu.memory_space<vmem>>, vector<1x8x128xf32>
    %77 = vector.shape_cast %76 : vector<1x8x128xf32> to vector<8x128xf32>
    %78 = vector.shape_cast %75 : vector<8x128xf32> to vector<1x8x128xf32>
    tpu.vector_store %arg4[%c0_28, %c0_29, %c0_30], %78 {strides = array<i32>} : memref<1x8x128xf32, #tpu.memory_space<vmem>>, vector<1x8x128xf32>,
    return
  }
  func.func @transform_0(%arg0: i32, %arg1: i32) -> (i32, i32, i32, i32) {
    %c0_i32 = arith.constant 0 : i32
    %c0_i32_0 = arith.constant 0 : i32
    %c0_i32_1 = arith.constant 0 : i32
    return %arg0, %c0_i32, %arg1, %c0_i32_0 : i32, i32, i32, i32
  }
  func.func @transform_1(%arg0: i32, %arg1: i32) -> (i32, i32, i32) {
    %c0_i32 = arith.constant 0 : i32
    %c0_i32_0 = arith.constant 0 : i32
    return %arg0, %arg1, %c0_i32 : i32, i32, i32
  }
  func.func @transform_2(%arg0: i32, %arg1: i32) -> (i32, i32, i32) {
    %c0_i32 = arith.constant 0 : i32
    %c0_i32_0 = arith.constant 0 : i32
    %c0_i32_1 = arith.constant 0 : i32
    return %arg0, %c0_i32, %c0_i32_0 : i32, i32, i32
  }
}

</mosaic_0001>

<bundles_post_ra>
// kernel: tpu_custom_call.1
= control target key start
LH: loop header
LB: loop body
LE: loop exit
PB: predicated region body
PF: predicated region fallthrough
CT: control target
= control target key end

     0   :  { %7 = vsyncpa [#allocation3], 0  ;;  %s879_s0 = inlined_call_operand.hbm [shape: f32[2,2,2,128], index: 0, kind: input, shape index: {}]   ;;  %s880_s1 = inlined_call_operand.hbm [shape: u8[2,2,128], index: 1, kind: input, shape index: {}]   ;;  %s881_s2 = inlined_call_operand.hbm [shape: f32[2,8,128], index: 2, kind: output, shape index: {}]  }
   0x1   :  { %9 = vsyncpa [#allocation3 + $0x1], 0 }
   0x2   :  { %10 = vsyncpa [#allocation6], 0 }
   0x3   :  { %12 = vsyncpa [#allocation6 + $0x1], 0 }
   0x4   :  { %13 = vsyncpa [#allocation4], 0 }
   0x5   :  { %15 = vsyncpa [#allocation4 + $0x1], 0  ;;  %s715_s9 = smov 0   ;;  %s717_s10 = smov 0  }
   0x6   :  { %s719_s11 = smov 0   ;;  %s721_s12 = smov 0  }
   0x7   :  { %s723_s13 = smov 0   ;;  %s725_s14 = smov 0  }
   0x8 LB: > { %s453_s15 = sadd.s32 4294967295, %s695_s14   ;;  %s454_s16 = sadd.s32 4294967294, %s695_s14   ;;  %s695_s14 = sphi %s725_s14, %s21_s14   ;;  %s691_s13 = sphi %s723_s13, %s893_s13   ;;  %s687_s12 = sphi %s721_s12, %s892_s12   ;;  %s683_s11 = sphi %s719_s11, %s891_s11   ;;  %s679_s10 = sphi %s717_s10, %s890_s10   ;;  %s675_s9 = sphi %s715_s9, %s889_s9  }
   0x9   : > { %s33_s17 = sadd.s32 1, %s691_s13  ;;  %s42_s18 = sadd.s32 1, %s683_s11 }
   0xa   : > { %p35_p0 = scmp.ge.s32.totalorder %s33_s17, 2  ;;  %p49_p1 = scmp.ne.s32.totalorder %s683_s11, %s679_s10 }
   0xb   : > { %p50_p2 = scmp.eq.s32.totalorder %s695_s14, 0  ;;  %p55_p3 = scmp.ne.s32.totalorder %s679_s10, %s675_s9 }
   0xc   : > { %s895_s17 = smov (%p35_p0, %s33_s17), 0  ;;  %p56_p5 = scmp.eq.s32.totalorder %s453_s15, 0 }
   0xd   : > { %p756_p4 = por %p50_p2, %p49_p1  ;;  %s37_s20 = ssub.s32 %s691_s13, %s895_s17 }
   0xe   : > { %p107_p6 = scmp.eq.s32.totalorder %s453_s15, 1  ;;  %p40_p7 = scmp.eq.s32.totalorder %s37_s20, 0 }
   0xf   : > { %p762_p8 = por %p56_p5, %p55_p3  ;;  %p113_p10 = scmp.eq.s32.totalorder %s454_s16, 1 }
  0x10   : > { %p766_p9 = por %p107_p6, %p49_p1  ;;  %p456_p12 = scmp.ge.s32.totalorder %s695_s14, 2 }
  0x11   : > { %s771_s23 = scalar_select %p40_p7, %s683_s11, %s42_s18  }
  0x12   : > { %p773_p11 = por %p113_p10, %p55_p3  ;;  %p490_p13 = scmp.lt.s32.totalorder %s695_s14, 2 }
  0x13   : > { %s133_s25 = sand.u32 1, %s683_s11   ;;  %s472_s27 = sshll.u32 %s691_s13, 2 }
  0x14   : > { %s457_s26 = sshll.u32 %s133_s25, 2  ;;  %s143_s30 = scalar_lea.hbm %s879_s0, %s472_s27 }
  0x15   : > { %s137_s3 = scalar_lea.vmem [#allocation2], %s457_s26  ;;  %s144_s5 = sshll.u32 %s143_s30, 4  ;;  %s145_s5 = int_to_ptr.hbm [resolvable:$true] %s144_s5 }
  0x16   : > { %s146_s4 = sshll.u32 %s137_s3, 4  ;;  %p786_p0 = pnand %p490_p13, %p756_p4  ;;  %s147_s4 = int_to_ptr.vmem [resolvable:$true] %s146_s4 }
  0x17   : > { %p460_p1 = scmp.ge.s32.totalorder %s695_s14, 1  ;;  %s134_s7 = scalar_lea.sflag [#allocation3], %s133_s25 }
  0x18   : > { %s697_s8 = smov 32   ;;  %s698_s15 = smov 2  }
  0x19   : > { %482 = dma.hbm_to_vmem [thread:$0]  (!%p786_p0), %s145_s5, 64, %s147_s4, %s134_s7, %s697_s8, %s697_s8, %s698_s15  }
  0x1a   : > { %p172_p2 = scmp.lt.s32.totalorder %s695_s14, 3  ;;  %s163_s20 = scalar_lea.hbm %s880_s1, %s691_s13 }
  0x1b   : > { %s165_s26 = sshll.u32 %s163_s20, 4  ;;  %s159_s19 = scalar_lea.vmem [#allocation5], %s133_s25  ;;  %s166_s26 = int_to_ptr.hbm [resolvable:$true] %s165_s26 }
  0x1c   : > { %p173_p3 = pnand %p460_p1, %p172_p2  ;;  %s167_s27 = sshll.u32 %s159_s19, 4  ;;  %s168_s27 = int_to_ptr.vmem [resolvable:$true] %s167_s27 }
  0x1d   : > { %s157_s28 = scalar_lea.sflag [#allocation6], %s133_s25  ;;  %s801_s29 = sand.u32 (!%p173_p3), 1, %s679_s10  }
  0x1e   : > { %485 = dma.hbm_to_vmem [thread:$0]  (!%p786_p0), %s166_s26, 16, %s168_s27, %s157_s28  }
  0x1f   : > { %176 = sbr.rel (%p173_p3) target bundleno = 94 (0x5e), region = 28  ;;  %s461_s30 = sshll.u32 (!%p173_p3), %s801_s29, 2 }
  0x20   : > { %s179_s3 = scalar_lea.sflag (!%p173_p3), [#allocation3], %s801_s29  ;;  %s182_s4 = scalar_lea.vmem (!%p173_p3), [#allocation2], %s461_s30 }
  0x24   : > { %662 = dma.done.wait (%p762_p8), %s179_s3, 64  }
  0x25   : > { %664 = vsyncadd (%p762_p8), %s179_s3, 4294967232  ;;  %s189_s25 = scalar_lea.sflag [#allocation6], %s801_s29  ;;  %s191_s5 = scalar_lea.vmem [#allocation5], %s801_s29 }
  0x26   : > { %666 = dma.done.wait (%p762_p8), %s189_s25, 16  }
  0x27   : > { %668 = vsyncadd (%p762_p8), %s189_s25, 4294967280  ;;  %v232_v0 = vld [vmem:[%s182_s4] sm:$0x3]  ;;  %v465_v1 = vld [vmem:[%s182_s4 + $0x2] sm:$0x3]  ;;  %v699_v11 = vmov 0.0  }
  0x28   : > { %v235_v2 = vsub.f32 %v232_v0, %v465_v1  ;;  %v222_v4 = vld [vmem:[%s191_s5] sm:$0x1]  ;;  %vm257_vm5 = vcmask 1041408   ;;  %v242_v21 = vmax.f32 %v232_v0, %v465_v1  ;;  %vm246_vm6 = vcmp.ge.f32.partialorder %v232_v0, %v465_v1  ;;  %s462_s21 = sshll.u32 %s801_s29, 3  ;;  %s469_s6 = sshll.u32 %s687_s12, 3 }
  0x29   : > { %v223_v7 = vunpack.c.0.s8 %v222_v4  ;;  %vm321_vm7 = vcmask 1040384   ;;  %vm324_vm8 = vcmask 1042432   ;;  %vm326_vm9 = vcmask 1043456   ;;  %s348_s15 = scalar_lea.hbm %s881_s2, %s469_s6  ;;  %s216_s12 = scalar_lea.vmem [#allocation7], %s462_s21 }
  0x2a   : > { %v236_v3 = vand.u32 2147483647, %v235_v2  ;;  %vm328_vm10 = vcmask 1044480   ;;  %vm330_vm11 = vcmask 1045504   ;;  %vm332_vm12 = vcmask 1046528   ;;  %s350_s16 = sshll.u32 %s216_s12, 4  ;;  %s351_s16 = int_to_ptr.vmem [resolvable:$true] %s350_s16 }
  0x2b   : > { %v224_v8 = vand.u32 255, %v223_v7  ;;  %s352_s18 = sshll.u32 %s348_s15, 4  ;;  %s338_s20 = scalar_lea.sflag [#allocation4], %s801_s29  ;;  %s353_s18 = int_to_ptr.hbm [resolvable:$true] %s352_s18 }
  0x2c   : > { %v237_v5 = vsub.f32 0.0, %v236_v3  ;;  %s623_s26 = sshra.s32 %s353_s18, 4  ;;  %s629_s30 = scalar_lea.hbm %s881_s2, 16  ;;  %s624_s26 = int_to_ptr.hbm [resolvable:$true] %s623_s26 }
  0x2d   : > { %vm228_vm0 = vcmp.ne.s32.totalorder %v224_v8, 255  ;;  %vm251_vm1 = vcmp.eq.s32.totalorder %v224_v8, 0  ;;  %vm225_vm2 = vcmp.ne.s32.totalorder %v224_v8, 254  ;;  %vm252_vm4 = vcmp.eq.s32.totalorder %v224_v8, 1  ;;  %s625_s19 = scalar_lea.hbm %s624_s26, 8  ;;  %p630_p7 = scmp.lt.s32.totalorder %s624_s26, %s881_s2 }
  0x2e   : > { %v238_v6 = vmul.f32 1.442695, %v237_v5  ;;  %v466_v12 = vsel %vm251_vm1, 1.0, %v699_v11  ;;  %vm817_vm3 = vmand %vm225_vm2, %vm228_vm0  ;;  %v467_v14 = vsel %vm252_vm4, 1.0, %v699_v11  ;;  %v463_v25 = vsel %vm225_vm2, 1.0, %v699_v11  ;;  %p626_p4 = scmp.ne.s32.totalorder %s624_s26, %s625_s19  ;;  %p631_p8 = scmp.lt.s32.totalorder %s629_s30, %s625_s19 }
  0x2f   : > { %v291_v15 = vsel %vm257_vm5, %v466_v12, 0.0  ;;  %v464_v16 = vsel %vm817_vm3, 1.0, %v699_v11  ;;  %v300_v17 = vsel %vm257_vm5, %v467_v14, 0.0  ;;  %v253_v30 = vsel %vm251_vm1, %v232_v0, %v465_v1 }
  0x30   : > { %543 = vpow2.f32 %v238_v6  ;;  %v292_v18 = vrot.slane %v291_v15, 4  ;;  %v314_v19 = vsel %vm257_vm5, %v464_v16, 0.0  ;;  %v301_v22 = vrot.slane %v300_v17, 4  ;;  %p627_p5 = pnand %p626_p4, %p766_p9  ;;  %p632_p10 = por %p631_p8, %p630_p7 }
  0x31   : > { %v315_v28 = vrot.slane %v314_v19, 4 }
  0x32   : > { %v293_v27 = vadd.f32 %v292_v18, %v291_v15  ;;  %v302_v33 = vadd.f32 %v301_v22, %v300_v17  ;;  %p628_p6 = pneg %p627_p5 }
  0x33   : > { %v316_v40 = vadd.f32 %v315_v28, %v314_v19 }
  0x34   : > { %v294_v39 = vrot.slane %v293_v27, 2  ;;  %v303_v48 = vrot.slane %v302_v33, 2  ;;  %p633_p13 = pnand %p632_p10, %p628_p6 }
  0x35   : > { %v317_v58 = vrot.slane %v316_v40, 2 }
  0x36   : > { %v544_v9 = vpop.eup %543  ;;  %v295_v61 = vadd.f32 %v294_v39, %v293_v27  ;;  %v304_v1 = vadd.f32 %v303_v48, %v302_v33 }
  0x37   : > { %v240_v10 = vadd.f32 1.0, %v544_v9  ;;  %v318_v7 = vadd.f32 %v317_v58, %v316_v40 }
  0x38   : > { %v305_v14 = vrot.slane %v304_v1, 1 }
  0x39   : > { %545 = vrcp.f32 %v240_v10  ;;  %v319_v19 = vrot.slane %v318_v7, 1 }
  0x3a   : > { %547 = vlog2.f32 %v240_v10  ;;  %v296_v10 = vrot.slane %v295_v61, 1  ;;  %v306_v22 = vadd.f32 %v305_v14, %v304_v1 }
  0x3f   : > { %v546_v20 = vpop.eup %545 }
  0x40   : > { %v548_v23 = vpop.eup %547  ;;  %v247_v24 = vmul.f32 %v546_v20, %v544_v9 }
  0x41   : > { %v244_v26 = vmul.f32 0.6931472, %v548_v23 }
  0x42   : > { %v248_v29 = vsel %vm246_vm6, %v546_v20, %v247_v24  ;;  %v297_v20 = vadd.f32 %v296_v10, %v295_v61 }
  0x43   : > { %v245_v31 = vadd.f32 %v244_v26, %v242_v21  ;;  %v249_v32 = vsel %vm225_vm2, %v248_v29, 0.0  ;;  %v320_v26 = vadd.f32 %v319_v19, %v318_v7 }
  0x44   : > { %v250_v34 = vsub.f32 %v463_v25, %v249_v32  ;;  %v256_v35 = vsel %vm251_vm1, %v249_v32, 0.0  ;;  %v273_v36 = vmul.f32 %v249_v32, %v249_v32 }
  0x45   : > { %v254_v37 = vsub.f32 %v245_v31, %v253_v30  ;;  %v258_v38 = vsel %vm257_vm5, %v256_v35, 0.0 }
  0x46   : > { %v259_v41 = vrot.slane %v258_v38, 4  ;;  %v265_v42 = vsel %vm252_vm4, %v250_v34, 0.0  ;;  %v274_v43 = vsel %vm257_vm5, %v273_v36, 0.0  ;;  %v281_v44 = vmul.f32 %v250_v34, %v250_v34 }
  0x47   : > { %v255_v45 = vsel %vm817_vm3, %v254_v37, 0.0  ;;  %v266_v46 = vsel %vm257_vm5, %v265_v42, 0.0  ;;  %v275_v47 = vrot.slane %v274_v43, 4 }
  0x48   : > { %v260_v49 = vadd.f32 %v259_v41, %v258_v38  ;;  %v267_v50 = vrot.slane %v266_v46, 4  ;;  %v282_v51 = vsel %vm257_vm5, %v281_v44, 0.0  ;;  %v307_v52 = vsel %vm257_vm5, %v255_v45, 0.0 }
  0x49   : > { %v276_v53 = vadd.f32 %v275_v47, %v274_v43  ;;  %v283_v54 = vrot.slane %v282_v51, 4  ;;  %v308_v55 = vrot.slane %v307_v52, 4 }
  0x4a   : > { %v261_v56 = vrot.slane %v260_v49, 2  ;;  %v268_v57 = vadd.f32 %v267_v50, %v266_v46 }
  0x4b   : > { %v277_v59 = vrot.slane %v276_v53, 2  ;;  %v284_v60 = vadd.f32 %v283_v54, %v282_v51  ;;  %v309_v62 = vadd.f32 %v308_v55, %v307_v52 }
  0x4c   : > { %v262_v63 = vadd.f32 %v261_v56, %v260_v49  ;;  %v269_v0 = vrot.slane %v268_v57, 2 }
  0x4d   : > { %v278_v2 = vadd.f32 %v277_v59, %v276_v53  ;;  %v285_v3 = vrot.slane %v284_v60, 2  ;;  %v310_v4 = vrot.slane %v309_v62, 2 }
  0x4e   : > { %v263_v5 = vrot.slane %v262_v63, 1  ;;  %v270_v6 = vadd.f32 %v269_v0, %v268_v57 }
  0x4f   : > { %v279_v8 = vrot.slane %v278_v2, 1  ;;  %v286_v9 = vadd.f32 %v285_v3, %v284_v60  ;;  %v311_v11 = vadd.f32 %v310_v4, %v309_v62 }
  0x50   : > { %v264_v12 = vadd.f32 %v263_v5, %v262_v63  ;;  %v271_v13 = vrot.slane %v270_v6, 1 }
  0x51   : > { %v287_v15 = vrot.slane %v286_v9, 1  ;;  %v280_v16 = vadd.f32 %v279_v8, %v278_v2  ;;  %v312_v17 = vrot.slane %v311_v11, 1 }
  0x52   : > { %v272_v18 = vadd.f32 %v271_v13, %v270_v6 }
  0x53   : > { %v288_v21 = vadd.f32 %v287_v15, %v286_v9  ;;  %v313_v24 = vadd.f32 %v312_v17, %v311_v11 }
  0x54   : > { %v322_v23 = vsel %vm321_vm7, %v264_v12, %v272_v18 }
  0x55   : > { %v323_v25 = vsel %vm257_vm5, %v322_v23, %v280_v16 }
  0x56   : > { %v325_v27 = vsel %vm324_vm8, %v323_v25, %v288_v21 }
  0x57   : > { %v327_v28 = vsel %vm326_vm9, %v325_v27, %v297_v20 }
  0x58   : > { %v329_v29 = vsel %vm328_vm10, %v327_v28, %v306_v22 }
  0x59   : > { %v331_v30 = vsel %vm330_vm11, %v329_v29, %v313_v24 }
  0x5a   : > { %v333_v31 = vsel %vm332_vm12, %v331_v30, %v320_v26 }
  0x5b   : > { %336 = vst [vmem:[%s216_s12] sm:$0xff] %v333_v31 }
  0x5c   : > { %636 = shalt.err (!%p633_p13)
}
  0x5d   : > { %477 = dma.vmem_to_hbm [thread:$0]  (%p766_p9), %s351_s16, 128, %s353_s18, %s338_s20  }
  0x5e PF: > { %s364_s29 = sand.u32 1, %s675_s9   ;;  %p487_p0 = pnand %p456_p12, %p773_p11 }
  0x5f   : > { %s365_s25 = scalar_lea.sflag [#allocation4], %s364_s29 }
  0x60   : > { %p488_p1 = pneg %p487_p0 }
  0x62   : > { %670 = dma.done.wait (%p488_p1), %s365_s25, 128  }
  0x63   : > { %672 = vsyncadd (%p488_p1), %s365_s25, 4294967168  ;;  %s21_s14 = sadd.s32 1, %s695_s14   ;;  %s889_s9 = smov %s679_s10 }
  0x64   : > { %p18_p2 = scmp.ge.s32.totalorder %s21_s14, 4   ;;  %s890_s10 = smov %s683_s11 }
  0x65   : > { %s891_s11 = smov %s771_s23  ;;  %s892_s12 = smov %s691_s13 }
  0x66   : > { %s893_s13 = smov %s895_s17  ;;  %20 = sbr.rel (!%p18_p2) target bundleno = 8 (0x8), region = 91 }
  0x6b   :  { %371 = vsyncpa [#allocation3], 1 }
  0x6c   :  { %373 = vsyncpa [#allocation3 + $0x1], 1 }
  0x6d   :  { %374 = vsyncpa [#allocation6], 1 }
  0x6e   :  { %376 = vsyncpa [#allocation6 + $0x1], 1 }
  0x6f   :  { %377 = vsyncpa [#allocation4], 1 }
  0x70   :  { %379 = vsyncpa [#allocation4 + $0x1], 1 }

</bundles_post_ra>
